<compile_context>
chip_gen: v7x
topology: tpu7x:2x2x1
jax: 0.10.0
libtpu: 0.0.40
codegen_flags: <defaults>
</compile_context>

<pallas_src>
import functools

import jax
import jax.numpy as jnp
from jax.experimental import pallas as pl
from jax.experimental.pallas import tpu as pltpu


def _dsconv_kernel(x_ref, wm_ref, dw_b_ref, pw_w_ref, pw_b_ref, o_ref,
                   *, H, W, K, pad, C_blk):
    # x_ref   : (1, C_blk, HW)    N_TILE images stacked along sublanes (C_blk = N_TILE*Cin)
    # wm_ref  : (K*K, C_blk, HW)  per-tap depthwise weight * BN scale * zero-pad mask
    # dw_b_ref: (C_blk, 1)        depthwise folded BN bias
    # pw_w_ref: (Co_blk, C_blk)   block-diagonal pointwise weight * BN scale
    # pw_b_ref: (Co_blk, 1)       pointwise folded BN bias
    # o_ref   : (1, Co_blk, HW)   NCHW-flat output tile (Co_blk = N_TILE*Cout)
    HW = H * W
    x = x_ref[0]                                          # (C_blk, HW) f32

    # ---- depthwise KxK conv: lane rolls (XLU) + pre-masked weights (2 VALU ops/tap) ----
    acc = jnp.broadcast_to(dw_b_ref[...], (C_blk, HW))    # start from folded BN bias
    for kh in range(K):
        for kw in range(K):
            j = kh * K + kw
            s = (kh - pad) * W + (kw - pad)               # flat input offset of this tap
            shift = (-s) % HW
            shifted = x if shift == 0 else pltpu.roll(x, shift, 1)
            acc = acc + shifted * wm_ref[j]               # mask already fused into weight
    dw_act = jnp.maximum(acc, 0.0)                        # (C_blk, HW)  ReLU

    # ---- pointwise 1x1 conv: block-diagonal (Co_blk, C_blk) @ (C_blk, HW) ----
    # Result is already lane-dense NCHW-flat; no epilogue transpose.
    # TODO(synk): on v6e/v7x production shapes cast the matmul inputs to bf16
    # (preferred_element_type=f32) for full MXU rate; kept f32 here for the 1e-4 check.
    y = jnp.dot(pw_w_ref[...], dw_act, preferred_element_type=jnp.float32)
    y = jnp.maximum(y + pw_b_ref[...], 0.0)               # (Co_blk, HW)  ReLU

    o_ref[0] = y.astype(o_ref.dtype)


def _pick_batch_tile(N, Cin):
    """Smallest divisor of N whose stacked channel count fills the 8 f32 sublanes."""
    divisors = [t for t in range(1, N + 1) if N % t == 0]
    for t in divisors:
        if (t * Cin) % 8 == 0:
            return t
    for t in divisors:
        if t * Cin >= 8:
            return t
    return N


def depthwise_separable_conv(x_nchw, params, *, kernel_size, padding):
    """x_nchw: (N, Cin, H, W) float32.  Returns (N, Cout, H, W) ('same' conv)."""
    N, Cin, H, W = x_nchw.shape
    K = kernel_size
    if 2 * padding != K - 1:
        # TODO(synk): general padding/stride needs different output indexing; the module
        # is used in its 'same' configuration (odd K, pad = (K-1)//2).
        raise NotImplementedError("only 'same' padding (2*padding == K-1) supported")
    HW = H * W
    Cout = params["pw_w"].shape[0]

    # ---- batch tiling: stack N_TILE images along the sublane (channel) axis ----
    n_tile = _pick_batch_tile(N, Cin)
    n_steps = N // n_tile
    C_blk, Co_blk = n_tile * Cin, n_tile * Cout

    # ---- fold BN into conv weights / bias (tiny O(params) work, outside the kernel) ----
    dw_w = (params["dw_w"].reshape(Cin, K * K)
            * params["dw_scale"][:, None]).astype(jnp.float32)              # (Cin, K*K)
    dw_b = jnp.tile(params["dw_bias"].reshape(Cin, 1).astype(jnp.float32),
                    (n_tile, 1))                                            # (C_blk, 1)
    pw_w = (params["pw_w"] * params["pw_scale"][:, None]).astype(jnp.float32)
    pw_w_bd = jnp.kron(jnp.eye(n_tile, dtype=jnp.float32), pw_w)            # (Co_blk, C_blk)
    pw_b = jnp.tile(params["pw_bias"].reshape(Cout, 1).astype(jnp.float32),
                    (n_tile, 1))                                            # (Co_blk, 1)

    # ---- pre-fuse zero-padding masks into the per-tap depthwise weights ----
    pos = jnp.arange(HW, dtype=jnp.int32)
    row, col = pos // W, pos % W
    mask_rows = []
    for kh in range(K):
        for kw in range(K):
            dh, dw_ = kh - padding, kw - padding
            mask_rows.append(((row + dh >= 0) & (row + dh < H) &
                              (col + dw_ >= 0) & (col + dw_ < W)).astype(jnp.float32))
    mask = jnp.stack(mask_rows)                                             # (K*K, HW)
    dw_w_tiled = jnp.tile(dw_w, (n_tile, 1))                                # (C_blk, K*K)
    w_masked = dw_w_tiled.T[:, :, None] * mask[:, None, :]                  # (K*K, C_blk, HW)
    # TODO(synk): for production H/W (e.g. 224^2) generate the boundary masks in-kernel
    # from broadcasted_iota; the resident (K*K, C_blk, HW) slab does not scale on v7x VMEM.

    # NCHW -> batch-tiled NCHW-flat is a free reshape (same bytes, no transpose, no pad).
    x_flat = x_nchw.reshape(n_steps, C_blk, HW).astype(jnp.float32)

    kernel = functools.partial(_dsconv_kernel, H=H, W=W, K=K, pad=padding, C_blk=C_blk)

    out_flat = pl.pallas_call(
        kernel,
        out_shape=jax.ShapeDtypeStruct((n_steps, Co_blk, HW), jnp.float32),
        grid_spec=pltpu.PrefetchScalarGridSpec(
            num_scalar_prefetch=0,
            grid=(n_steps,),
            in_specs=[
                pl.BlockSpec((1, C_blk, HW), lambda n: (n, 0, 0)),       # activations
                pl.BlockSpec((K * K, C_blk, HW), lambda n: (0, 0, 0)),   # masked dw weights
                pl.BlockSpec((C_blk, 1), lambda n: (0, 0)),              # dw bias
                pl.BlockSpec((Co_blk, C_blk), lambda n: (0, 0)),         # block-diag pw weights
                pl.BlockSpec((Co_blk, 1), lambda n: (0, 0)),             # pw bias
            ],
            out_specs=pl.BlockSpec((1, Co_blk, HW), lambda n: (n, 0, 0)),
        ),
        compiler_params=pltpu.CompilerParams(
            dimension_semantics=("parallel",)),
    )(x_flat, w_masked, dw_b, pw_w_bd, pw_b)

    # TODO(synk): for production H/W/C add a row-band grid axis (K-1 halo) sized for
    # v7x's 64 MiB VMEM (raise vmem_limit_bytes), keep >=2 parallel steps for its 2 TCs,
    # and emit bf16 activations/outputs to halve HBM traffic (this op is memory-bound).
    return out_flat.reshape(N, Cout, H, W)


def make_params(key, in_planes, out_planes, kernel_size):
    """Deterministic synthetic params; BN kept as per-channel scale/bias (eval mode)."""
    k = jax.random.split(key, 8)
    eps = 1e-5
    # depthwise conv weight, PyTorch (Cin, 1, K, K) squeezed to (Cin, K, K)
    dw_w = jax.random.normal(k[0], (in_planes, kernel_size, kernel_size),
                             jnp.float32) * 0.2
    dw_gamma = 1.0 + 0.1 * jax.random.normal(k[1], (in_planes,), jnp.float32)
    dw_beta = 0.1 * jax.random.normal(k[2], (in_planes,), jnp.float32)
    dw_mean = 0.1 * jax.random.normal(k[3], (in_planes,), jnp.float32)
    dw_var = jnp.abs(jax.random.normal(k[4], (in_planes,), jnp.float32)) + 0.5
    dw_scale = dw_gamma / jnp.sqrt(dw_var + eps)
    dw_bias = dw_beta - dw_mean * dw_scale
    # pointwise conv weight, PyTorch (Cout, Cin, 1, 1) squeezed to (Cout, Cin)
    pw_w = jax.random.normal(k[5], (out_planes, in_planes), jnp.float32) * 0.2
    pw_gamma = 1.0 + 0.1 * jax.random.normal(k[6], (out_planes,), jnp.float32)
    pw_beta = 0.1 * jax.random.normal(k[7], (out_planes,), jnp.float32)
    pw_mean = jnp.zeros((out_planes,), jnp.float32)
    pw_var = jnp.ones((out_planes,), jnp.float32)
    pw_scale = pw_gamma / jnp.sqrt(pw_var + eps)
    pw_bias = pw_beta - pw_mean * pw_scale
    return {"dw_w": dw_w, "dw_scale": dw_scale, "dw_bias": dw_bias,
            "pw_w": pw_w, "pw_scale": pw_scale, "pw_bias": pw_bias}


def _reference(x_nchw, params, *, kernel_size, padding):
    """Plain-JAX reference mirroring the PyTorch NCHW module (eval-mode BN folded)."""
    Cin = x_nchw.shape[1]
    dw_w = params["dw_w"][:, None]                                    # (Cin,1,K,K)
    dw = jax.lax.conv_general_dilated(
        x_nchw, dw_w, window_strides=(1, 1),
        padding=[(padding, padding), (padding, padding)],
        feature_group_count=Cin,
        dimension_numbers=("NCHW", "OIHW", "NCHW"),
        precision=jax.lax.Precision.HIGHEST)
    dw = dw * params["dw_scale"][None, :, None, None] \
        + params["dw_bias"][None, :, None, None]
    dw = jnp.maximum(dw, 0.0)
    pw_w = params["pw_w"][:, :, None, None]                           # (Cout,Cin,1,1)
    pw = jax.lax.conv_general_dilated(
        dw, pw_w, window_strides=(1, 1), padding=[(0, 0), (0, 0)],
        dimension_numbers=("NCHW", "OIHW", "NCHW"),
        precision=jax.lax.Precision.HIGHEST)
    pw = pw * params["pw_scale"][None, :, None, None] \
        + params["pw_bias"][None, :, None, None]
    return jnp.maximum(pw, 0.0)


if __name__ == "__main__":
    key = jax.random.PRNGKey(0)
    k_x, k_p = jax.random.split(key)

    N, Cin, H, W = 2, 4, 16, 16
    Cout, K, PAD = 8, 3, 1

    x = jax.random.normal(k_x, (N, Cin, H, W), jnp.float32)
    params = make_params(k_p, Cin, Cout, K)

    out = depthwise_separable_conv(x, params, kernel_size=K, padding=PAD)
    out = jax.block_until_ready(out)

    ref = _reference(x, params, kernel_size=K, padding=PAD)
    assert out.shape == (N, Cout, H, W)
    max_err = float(jnp.max(jnp.abs(out - ref)))
    assert jnp.allclose(out, ref, atol=1e-4, rtol=1e-4), max_err

    print("KERNEL_OK")
</pallas_src>

<mosaic_0001>
module attributes {stable_mosaic.version = 11 : i64} {
  func.func @_dsconv_kernel(%arg0: i32, %arg1: memref<1x8x256xf32, #tpu.memory_space<vmem>>, %arg2: memref<9x8x256xf32, #tpu.memory_space<vmem>>, %arg3: memref<8x1xf32, #tpu.memory_space<vmem>>, %arg4: memref<16x8xf32, #tpu.memory_space<vmem>>, %arg5: memref<16x1xf32, #tpu.memory_space<vmem>>, %arg6: memref<1x16x256xf32, #tpu.memory_space<vmem>>) attributes {dimension_semantics = [#tpu.dimension_semantics<parallel>], iteration_bounds = array<i64: 1>, scalar_prefetch = 0 : i64, scratch_operands = 0 : i64, tpu.core_type = #tpu.core_type<tc>, window_params = [{transform_indices = @transform_0, window_bounds = array<i64: 1, 8, 256>}, {pipeline_mode = #tpu.pipeline_mode<synchronous>, transform_indices = @transform_1, window_bounds = array<i64: 9, 8, 256>}, {pipeline_mode = #tpu.pipeline_mode<synchronous>, transform_indices = @transform_2, window_bounds = array<i64: 8, 1>}, {pipeline_mode = #tpu.pipeline_mode<synchronous>, transform_indices = @transform_3, window_bounds = array<i64: 16, 8>}, {pipeline_mode = #tpu.pipeline_mode<synchronous>, transform_indices = @transform_4, window_bounds = array<i64: 16, 1>}, {transform_indices = @transform_5, window_bounds = array<i64: 1, 16, 256>}]} {
    %c0 = arith.constant 0 : index
    %c0_0 = arith.constant 0 : index
    %c0_1 = arith.constant 0 : index
    %0 = vector.load %arg1[%c0, %c0_0, %c0_1] : memref<1x8x256xf32, #tpu.memory_space<vmem>>, vector<1x8x256xf32>
    %1 = vector.shape_cast %0 : vector<1x8x256xf32> to vector<8x256xf32>
    %c0_2 = arith.constant 0 : index
    %c0_3 = arith.constant 0 : index
    %2 = vector.load %arg3[%c0_2, %c0_3] : memref<8x1xf32, #tpu.memory_space<vmem>>, vector<8x1xf32>
    %3 = vector.shape_cast %2 : vector<8x1xf32> to vector<8x1xf32>
    %4 = vector.broadcast %3 : vector<8x1xf32> to vector<8x256xf32>
    %c17_i32 = arith.constant 17 : i32
    %5 = tpu.dynamic_rotate %1 by %c17_i32 dim 1 : vector<8x256xf32>, i32 -> vector<8x256xf32>
    %c0_4 = arith.constant 0 : index
    %c0_5 = arith.constant 0 : index
    %c0_6 = arith.constant 0 : index
    %6 = vector.load %arg2[%c0_4, %c0_5, %c0_6] : memref<9x8x256xf32, #tpu.memory_space<vmem>>, vector<1x8x256xf32>
    %7 = vector.shape_cast %6 : vector<1x8x256xf32> to vector<8x256xf32>
    %8 = arith.mulf %5, %7 : vector<8x256xf32>
    %9 = arith.addf %4, %8 : vector<8x256xf32>
    %c16_i32 = arith.constant 16 : i32
    %10 = tpu.dynamic_rotate %1 by %c16_i32 dim 1 : vector<8x256xf32>, i32 -> vector<8x256xf32>
    %c1 = arith.constant 1 : index
    %c0_7 = arith.constant 0 : index
    %c0_8 = arith.constant 0 : index
    %11 = vector.load %arg2[%c1, %c0_7, %c0_8] : memref<9x8x256xf32, #tpu.memory_space<vmem>>, vector<1x8x256xf32>
    %12 = vector.shape_cast %11 : vector<1x8x256xf32> to vector<8x256xf32>
    %13 = arith.mulf %10, %12 : vector<8x256xf32>
    %14 = arith.addf %9, %13 : vector<8x256xf32>
    %c15_i32 = arith.constant 15 : i32
    %15 = tpu.dynamic_rotate %1 by %c15_i32 dim 1 : vector<8x256xf32>, i32 -> vector<8x256xf32>
    %c2 = arith.constant 2 : index
    %c0_9 = arith.constant 0 : index
    %c0_10 = arith.constant 0 : index
    %16 = vector.load %arg2[%c2, %c0_9, %c0_10] : memref<9x8x256xf32, #tpu.memory_space<vmem>>, vector<1x8x256xf32>
    %17 = vector.shape_cast %16 : vector<1x8x256xf32> to vector<8x256xf32>
    %18 = arith.mulf %15, %17 : vector<8x256xf32>
    %19 = arith.addf %14, %18 : vector<8x256xf32>
    %c1_i32 = arith.constant 1 : i32
    %20 = tpu.dynamic_rotate %1 by %c1_i32 dim 1 : vector<8x256xf32>, i32 -> vector<8x256xf32>
    %c3 = arith.constant 3 : index
    %c0_11 = arith.constant 0 : index
    %c0_12 = arith.constant 0 : index
    %21 = vector.load %arg2[%c3, %c0_11, %c0_12] : memref<9x8x256xf32, #tpu.memory_space<vmem>>, vector<1x8x256xf32>
    %22 = vector.shape_cast %21 : vector<1x8x256xf32> to vector<8x256xf32>
    %23 = arith.mulf %20, %22 : vector<8x256xf32>
    %24 = arith.addf %19, %23 : vector<8x256xf32>
    %c4 = arith.constant 4 : index
    %c0_13 = arith.constant 0 : index
    %c0_14 = arith.constant 0 : index
    %25 = vector.load %arg2[%c4, %c0_13, %c0_14] : memref<9x8x256xf32, #tpu.memory_space<vmem>>, vector<1x8x256xf32>
    %26 = vector.shape_cast %25 : vector<1x8x256xf32> to vector<8x256xf32>
    %27 = arith.mulf %1, %26 : vector<8x256xf32>
    %28 = arith.addf %24, %27 : vector<8x256xf32>
    %c255_i32 = arith.constant 255 : i32
    %29 = tpu.dynamic_rotate %1 by %c255_i32 dim 1 : vector<8x256xf32>, i32 -> vector<8x256xf32>
    %c5 = arith.constant 5 : index
    %c0_15 = arith.constant 0 : index
    %c0_16 = arith.constant 0 : index
    %30 = vector.load %arg2[%c5, %c0_15, %c0_16] : memref<9x8x256xf32, #tpu.memory_space<vmem>>, vector<1x8x256xf32>
    %31 = vector.shape_cast %30 : vector<1x8x256xf32> to vector<8x256xf32>
    %32 = arith.mulf %29, %31 : vector<8x256xf32>
    %33 = arith.addf %28, %32 : vector<8x256xf32>
    %c241_i32 = arith.constant 241 : i32
    %34 = tpu.dynamic_rotate %1 by %c241_i32 dim 1 : vector<8x256xf32>, i32 -> vector<8x256xf32>
    %c6 = arith.constant 6 : index
    %c0_17 = arith.constant 0 : index
    %c0_18 = arith.constant 0 : index
    %35 = vector.load %arg2[%c6, %c0_17, %c0_18] : memref<9x8x256xf32, #tpu.memory_space<vmem>>, vector<1x8x256xf32>
    %36 = vector.shape_cast %35 : vector<1x8x256xf32> to vector<8x256xf32>
    %37 = arith.mulf %34, %36 : vector<8x256xf32>
    %38 = arith.addf %33, %37 : vector<8x256xf32>
    %c240_i32 = arith.constant 240 : i32
    %39 = tpu.dynamic_rotate %1 by %c240_i32 dim 1 : vector<8x256xf32>, i32 -> vector<8x256xf32>
    %c7 = arith.constant 7 : index
    %c0_19 = arith.constant 0 : index
    %c0_20 = arith.constant 0 : index
    %40 = vector.load %arg2[%c7, %c0_19, %c0_20] : memref<9x8x256xf32, #tpu.memory_space<vmem>>, vector<1x8x256xf32>
    %41 = vector.shape_cast %40 : vector<1x8x256xf32> to vector<8x256xf32>
    %42 = arith.mulf %39, %41 : vector<8x256xf32>
    %43 = arith.addf %38, %42 : vector<8x256xf32>
    %c239_i32 = arith.constant 239 : i32
    %44 = tpu.dynamic_rotate %1 by %c239_i32 dim 1 : vector<8x256xf32>, i32 -> vector<8x256xf32>
    %c8 = arith.constant 8 : index
    %c0_21 = arith.constant 0 : index
    %c0_22 = arith.constant 0 : index
    %45 = vector.load %arg2[%c8, %c0_21, %c0_22] : memref<9x8x256xf32, #tpu.memory_space<vmem>>, vector<1x8x256xf32>
    %46 = vector.shape_cast %45 : vector<1x8x256xf32> to vector<8x256xf32>
    %47 = arith.mulf %44, %46 : vector<8x256xf32>
    %48 = arith.addf %43, %47 : vector<8x256xf32>
    %cst = arith.constant 0.000000e+00 : f32
    %49 = vector.broadcast %cst : f32 to vector<8x256xf32>
    %50 = arith.maximumf %48, %49 : vector<8x256xf32>
    %c0_23 = arith.constant 0 : index
    %c0_24 = arith.constant 0 : index
    %51 = vector.load %arg4[%c0_23, %c0_24] : memref<16x8xf32, #tpu.memory_space<vmem>>, vector<16x8xf32>
    %cst_25 = arith.constant dense<0.000000e+00> : vector<16x256xf32>
    %52 = tpu.matmul %51, %50, %cst_25 {dimension_numbers = #tpu.dot_dimension_numbers<[1], [0], [0], [1], [0, 0, 1, 1], [], []>} : vector<16x8xf32>, vector<8x256xf32>, vector<16x256xf32> -> vector<16x256xf32>
    %c0_26 = arith.constant 0 : index
    %c0_27 = arith.constant 0 : index
    %53 = vector.load %arg5[%c0_26, %c0_27] : memref<16x1xf32, #tpu.memory_space<vmem>>, vector<16x1xf32>
    %54 = vector.broadcast %53 : vector<16x1xf32> to vector<16x256xf32>
    %55 = arith.addf %52, %54 : vector<16x256xf32>
    %cst_28 = arith.constant 0.000000e+00 : f32
    %56 = vector.broadcast %cst_28 : f32 to vector<16x256xf32>
    %57 = arith.maximumf %55, %56 : vector<16x256xf32>
    %c0_29 = arith.constant 0 : index
    %c0_30 = arith.constant 0 : index
    %c0_31 = arith.constant 0 : index
    %58 = vector.load %arg6[%c0_29, %c0_30, %c0_31] : memref<1x16x256xf32, #tpu.memory_space<vmem>>, vector<1x16x256xf32>
    %59 = vector.shape_cast %58 : vector<1x16x256xf32> to vector<16x256xf32>
    %60 = vector.shape_cast %57 : vector<16x256xf32> to vector<1x16x256xf32>
    tpu.vector_store %arg6[%c0_29, %c0_30, %c0_31], %60 {strides = array<i32>} : memref<1x16x256xf32, #tpu.memory_space<vmem>>, vector<1x16x256xf32>,
    return
  }
  func.func @transform_0(%arg0: i32) -> (i32, i32, i32) {
    %c0_i32 = arith.constant 0 : i32
    %c0_i32_0 = arith.constant 0 : i32
    %c0_i32_1 = arith.constant 0 : i32
    return %arg0, %c0_i32, %c0_i32_0 : i32, i32, i32
  }
  func.func @transform_1(%arg0: i32) -> (i32, i32, i32) {
    %c0_i32 = arith.constant 0 : i32
    %c0_i32_0 = arith.constant 0 : i32
    %c0_i32_1 = arith.constant 0 : i32
    %c0_i32_2 = arith.constant 0 : i32
    return %c0_i32, %c0_i32_0, %c0_i32_1 : i32, i32, i32
  }
  func.func @transform_2(%arg0: i32) -> (i32, i32) {
    %c0_i32 = arith.constant 0 : i32
    %c0_i32_0 = arith.constant 0 : i32
    %c0_i32_1 = arith.constant 0 : i32
    return %c0_i32, %c0_i32_0 : i32, i32
  }
  func.func @transform_3(%arg0: i32) -> (i32, i32) {
    %c0_i32 = arith.constant 0 : i32
    %c0_i32_0 = arith.constant 0 : i32
    %c0_i32_1 = arith.constant 0 : i32
    return %c0_i32, %c0_i32_0 : i32, i32
  }
  func.func @transform_4(%arg0: i32) -> (i32, i32) {
    %c0_i32 = arith.constant 0 : i32
    %c0_i32_0 = arith.constant 0 : i32
    %c0_i32_1 = arith.constant 0 : i32
    return %c0_i32, %c0_i32_0 : i32, i32
  }
  func.func @transform_5(%arg0: i32) -> (i32, i32, i32) {
    %c0_i32 = arith.constant 0 : i32
    %c0_i32_0 = arith.constant 0 : i32
    %c0_i32_1 = arith.constant 0 : i32
    return %arg0, %c0_i32, %c0_i32_0 : i32, i32, i32
  }
}

</mosaic_0001>

<bundles_post_ra>
// kernel: tpu_custom_call.1
= control target key start
LH: loop header
LB: loop body
LE: loop exit
PB: predicated region body
PF: predicated region fallthrough
CT: control target
= control target key end

     0   :  { %10 = vsyncpa [#allocation3], 0  ;;  %s483_s0 = inlined_call_operand.vmem [shape: f32[1,8,256], index: 0, kind: input, shape index: {}]   ;;  %s484_s1 = inlined_call_operand.hbm [shape: f32[9,8,256], index: 1, kind: input, shape index: {}]   ;;  %s485_s2 = inlined_call_operand.vmem [shape: f32[8,1], index: 2, kind: input, shape index: {}]   ;;  %s486_s3 = inlined_call_operand.vmem [shape: f32[16,8], index: 3, kind: input, shape index: {}]   ;;  %s487_s4 = inlined_call_operand.vmem [shape: f32[16,1], index: 4, kind: input, shape index: {}]   ;;  %s488_s5 = inlined_call_operand.hbm [shape: f32[1,16,256], index: 5, kind: output, shape index: {}]  }
   0x1   :  { %11 = vsyncpa [#allocation4], 0  ;;  %s355_s18 = smov [#allocation2]   ;;  %s307_s22 = scalar_lea.hbm %s484_s1, 2304 }
   0x2   :  { %s19_s19 = sshll.u32 %s355_s18, 4  ;;  %p308_p0 = scmp.ne.s32.totalorder %s484_s1, %s307_s22  ;;  %s20_s19 = int_to_ptr.vmem [resolvable:$true] %s19_s19 }
   0x3   :  { %p311_p1 = scmp.lt.u32.totalorder %s307_s22, %s484_s1 }
   0x5   :  { %p313_p2 = pnand %p311_p1, %p308_p0 }
   0x7   :  { %316 = shalt.err (!%p313_p2)
}
   0x8   :  { %s317_s27 = scalar_lea.vmem %s20_s19, 2304  ;;  %p322_p4 = scmp.lt.s32.totalorder %s20_s19, %s20_s19 }
   0x9   :  { %p318_p3 = scmp.ne.s32.totalorder %s20_s19, %s317_s27  ;;  %p323_p5 = scmp.lt.s32.totalorder %s317_s27, %s317_s27 }
   0xb   :  { %p324_p6 = por %p323_p5, %p322_p4 }
   0xd   :  { %p325_p7 = pnand %p324_p6, %p318_p3 }
   0xf   :  { %328 = shalt.err (!%p325_p7)
}
  0x10   :  { %s356_s28 = smov 256   ;;  %s357_s29 = smov 16  }
  0x11   :  { %25 = dma.hbm_to_vmem [thread:$0]  %s484_s1, 2304, %s20_s19, [#allocation3], %s356_s28, %s356_s28, %s357_s29  }
  0x12   :  { %351 = dma.done.wait [#allocation3], 2304  }
  0x13   :  { %352 = vsyncadd [#allocation3], 4294964992  ;;  %v358_v0 = vmov 0   ;;  %v37_v1 = vld [vmem:[%s485_s2] sm:$0xff]  ;;  %v419_v2 = vld [vmem:[%s483_s0 + $0x8] sm:$0xff]  ;;  %s359_s11 = smov 17   ;;  %v47_v9 = vlaneseq }
  0x14   :  { %305 = vset.pattern.permute.xlu0 %v358_v0  ;;  %306 = vset.pattern.permute.xlu1 %v358_v0  ;;  %v425_v3 = vld [vmem:[%s483_s0] sm:$0xff]  ;;  %s360_s2 = smov 15   ;;  %s361_s13 = smov 1   ;;  %v168_v4 = vld [vmem:[%s487_s4 + $0x8] sm:$0xff]  ;;  %v366_v5 = vmov 0.0   ;;  %v66_v20 = vld [vmem:[#allocation2 + $0x10] sm:$0xff] }
  0x15   :  { %40 = vperm.xlu0 %305, %v37_v1   ;;  %45 = vrot.lane.b32.xlu1 %v419_v2, %s359_s11  ;;  %s362_s0 = smov 127   ;;  %s363_s14 = smov 113   ;;  %v167_v6 = vld [vmem:[%s487_s4] sm:$0xff]  ;;  %v450_v12 = vand.u32 127, %v47_v9  ;;  %v53_v17 = vld [vmem:[#allocation2 + $0x8] sm:$0xff]  ;;  %v67_v21 = vld [vmem:[#allocation2 + $0x18] sm:$0xff] }
  0x16   :  { %s364_s15 = smov 112   ;;  %s365_s16 = smov 111   ;;  %250 = vmatprep.mubr.f32.mxu0 %v366_v5  ;;  %256 = vmatprep.mubr.f32.mxu1 %v366_v5  ;;  %v52_v16 = vld [vmem:[#allocation2] sm:$0xff]  ;;  %v81_v29 = vld [vmem:[#allocation2 + $0x28] sm:$0xff]  ;;  %v94_v34 = vld [vmem:[#allocation2 + $0x30] sm:$0xff]  ;;  %vm179_vm8 = vcmask 64512  }
  0x17   :  { %vm49_vm0 = vcmp.lt.s32.totalorder %v450_v12, 17  ;;  %vm62_vm1 = vcmp.lt.s32.totalorder %v450_v12, 16  ;;  %vm76_vm2 = vcmp.lt.s32.totalorder %v450_v12, 15  ;;  %v80_v28 = vld [vmem:[#allocation2 + $0x20] sm:$0xff]  ;;  %vm90_vm3 = vcmp.lt.s32.totalorder %v450_v12, 1  ;;  %v95_v35 = vld [vmem:[#allocation2 + $0x38] sm:$0xff] }
  0x18   :  { %v102_v47 = vld [vmem:[#allocation2 + $0x48] sm:$0xff]  ;;  %v101_v49 = vld [vmem:[#allocation2 + $0x40] sm:$0xff]  ;;  %vm111_vm4 = vcmp.lt.s32.totalorder %v450_v12, 127  ;;  %vm125_vm5 = vcmp.lt.s32.totalorder %v450_v12, 113  ;;  %v115_v57 = vld [vmem:[#allocation2 + $0x50] sm:$0xff]  ;;  %vm139_vm6 = vcmp.lt.s32.totalorder %v450_v12, 112 }
  0x19   :  { %43 = vrot.lane.b32.xlu0 %v425_v3, %s359_s11  ;;  %58 = vrot.lane.b32.xlu1 %v425_v3, %s357_s29  ;;  %v104_v53 = vmul.f32 %v102_v47, %v419_v2  ;;  %v103_v56 = vmul.f32 %v101_v49, %v425_v3  ;;  %v116_v58 = vld [vmem:[#allocation2 + $0x58] sm:$0xff]  ;;  %v129_v63 = vld [vmem:[#allocation2 + $0x60] sm:$0xff]  ;;  %v130_v0 = vld [vmem:[#allocation2 + $0x68] sm:$0xff]  ;;  %vm153_vm7 = vcmp.lt.s32.totalorder %v450_v12, 111  ;;  %s367_s24 = smov [#allocation5]  }
  0x1a   :  { %s276_s25 = sshll.u32 %s367_s24, 4  ;;  %s277_s25 = int_to_ptr.vmem [resolvable:$true] %s276_s25 }
  0x1b   :  { %p334_p9 = scmp.lt.s32.totalorder %s277_s25, %s277_s25 }
  0x1d   :  { %60 = vrot.lane.b32.xlu0 %v419_v2, %s357_s29  ;;  %72 = vrot.lane.b32.xlu1 %v425_v3, %s360_s2 }
  0x21   :  { %74 = vrot.lane.b32.xlu0 %v419_v2, %s360_s2  ;;  %86 = vrot.lane.b32.xlu1 %v425_v3, %s361_s13 }
  0x25   :  { %88 = vrot.lane.b32.xlu0 %v419_v2, %s361_s13  ;;  %107 = vrot.lane.b32.xlu1 %v425_v3, %s362_s0 }
  0x29   :  { %109 = vrot.lane.b32.xlu0 %v419_v2, %s362_s0  ;;  %121 = vrot.lane.b32.xlu1 %v425_v3, %s363_s14 }
  0x2d   :  { %123 = vrot.lane.b32.xlu0 %v419_v2, %s363_s14  ;;  %135 = vrot.lane.b32.xlu1 %v425_v3, %s364_s15 }
  0x31   :  { %137 = vrot.lane.b32.xlu0 %v419_v2, %s364_s15  ;;  %149 = vrot.lane.b32.xlu1 %v425_v3, %s365_s16  ;;  %v144_v3 = vld [vmem:[#allocation2 + $0x78] sm:$0xff] }
  0x35   :  { %151 = vrot.lane.b32.xlu0 %v419_v2, %s365_s16  ;;  %171 = vperm.xlu1 %306, %v167_v6  }
  0x39   :  { %176 = vperm.xlu0 %305, %v168_v4  }
  0x87   :  { %v46_v7 = vpop.permute.xlu1 %45 }
  0x8b   :  { %v59_v8 = vpop.permute.xlu1 %58 }
  0x8f   :  { %v73_v11 = vpop.permute.xlu1 %72 }
  0x93   :  { %v87_v14 = vpop.permute.xlu1 %86 }
  0x94   :  { %v41_v10 = vpop.permute.xlu0 %40 }
  0x97   :  { %v108_v27 = vpop.permute.xlu1 %107 }
  0x98   :  { %v44_v13 = vpop.permute.xlu0 %43 }
  0x99   :  { %v50_v18 = vsel %vm49_vm0, %v44_v13, %v46_v7  ;;  %v51_v19 = vsel %vm49_vm0, %v46_v7, %v44_v13 }
  0x9a   :  { %v54_v24 = vmul.f32 %v52_v16, %v51_v19  ;;  %v55_v25 = vmul.f32 %v53_v17, %v50_v18 }
  0x9b   :  { %v122_v48 = vpop.permute.xlu1 %121 }
  0x9c   :  { %v61_v15 = vpop.permute.xlu0 %60  ;;  %v56_v36 = vadd.f32 %v54_v24, %v41_v10  ;;  %v57_v37 = vadd.f32 %v55_v25, %v41_v10 }
  0x9d   :  { %v63_v22 = vsel %vm62_vm1, %v59_v8, %v61_v15  ;;  %v64_v23 = vsel %vm62_vm1, %v61_v15, %v59_v8  ;;  %v143_v8 = vld [vmem:[#allocation2 + $0x70] sm:$0xff] }
  0x9e   :  { %v68_v32 = vmul.f32 %v66_v20, %v64_v23  ;;  %v69_v33 = vmul.f32 %v67_v21, %v63_v22  ;;  %v157_v20 = vld [vmem:[#allocation2 + $0x80] sm:$0xff]  ;;  %v158_v21 = vld [vmem:[#allocation2 + $0x88] sm:$0xff] }
  0x9f   :  { %v136_v62 = vpop.permute.xlu1 %135 }
  0xa0   :  { %v75_v26 = vpop.permute.xlu0 %74  ;;  %v70_v43 = vadd.f32 %v68_v32, %v56_v36  ;;  %v71_v44 = vadd.f32 %v69_v33, %v57_v37 }
  0xa1   :  { %v77_v30 = vsel %vm76_vm2, %v73_v11, %v75_v26  ;;  %v78_v31 = vsel %vm76_vm2, %v75_v26, %v73_v11 }
  0xa2   :  { %v82_v38 = vmul.f32 %v80_v28, %v78_v31  ;;  %v83_v39 = vmul.f32 %v81_v29, %v77_v30 }
  0xa3   :  { %v150_v19 = vpop.permute.xlu1 %149 }
  0xa4   :  { %v89_v40 = vpop.permute.xlu0 %88  ;;  %v84_v50 = vadd.f32 %v82_v38, %v70_v43  ;;  %v85_v51 = vadd.f32 %v83_v39, %v71_v44 }
  0xa5   :  { %v91_v41 = vsel %vm90_vm3, %v87_v14, %v89_v40  ;;  %v92_v42 = vsel %vm90_vm3, %v89_v40, %v87_v14 }
  0xa6   :  { %v96_v45 = vmul.f32 %v94_v34, %v92_v42  ;;  %v97_v46 = vmul.f32 %v95_v35, %v91_v41  ;;  %v165_v34 = vld [vmem:[%s486_s3] sm:$0xff]  ;;  %v166_v35 = vld [vmem:[%s486_s3 + $0x8] sm:$0xff]  ;;  %s329_s3 = scalar_lea.vmem %s277_s25, 512 }
  0xa7   :  { %p330_p8 = scmp.ne.s32.totalorder %s277_s25, %s329_s3  ;;  %p335_p10 = scmp.lt.s32.totalorder %s329_s3, %s329_s3 }
  0xa8   :  { %v110_v52 = vpop.permute.xlu0 %109  ;;  %v98_v54 = vadd.f32 %v96_v45, %v84_v50  ;;  %v99_v55 = vadd.f32 %v97_v46, %v85_v51 }
  0xa9   :  { %v112_v59 = vsel %vm111_vm4, %v108_v27, %v110_v52  ;;  %v113_v60 = vsel %vm111_vm4, %v110_v52, %v108_v27  ;;  %p336_p11 = por %p335_p10, %p334_p9 }
  0xaa   :  { %v106_v5 = vadd.f32 %v104_v53, %v99_v55  ;;  %v105_v2 = vadd.f32 %v103_v56, %v98_v54  ;;  %v117_v6 = vmul.f32 %v115_v57, %v112_v59  ;;  %v118_v7 = vmul.f32 %v116_v58, %v113_v60 }
  0xab   :  { %p337_p12 = pnand %p336_p11, %p330_p8 }
  0xac   :  { %v124_v61 = vpop.permute.xlu0 %123  ;;  %v119_v15 = vadd.f32 %v117_v6, %v105_v2  ;;  %v120_v16 = vadd.f32 %v118_v7, %v106_v5 }
  0xad   :  { %v126_v1 = vsel %vm125_vm5, %v122_v48, %v124_v61  ;;  %v127_v4 = vsel %vm125_vm5, %v124_v61, %v122_v48 }
  0xae   :  { %v131_v9 = vmul.f32 %v129_v63, %v126_v1  ;;  %v132_v10 = vmul.f32 %v130_v0, %v127_v4 }
  0xb0   :  { %v138_v11 = vpop.permute.xlu0 %137  ;;  %v133_v22 = vadd.f32 %v131_v9, %v119_v15  ;;  %v134_v23 = vadd.f32 %v132_v10, %v120_v16 }
  0xb1   :  { %v140_v13 = vsel %vm139_vm6, %v136_v62, %v138_v11  ;;  %v141_v14 = vsel %vm139_vm6, %v138_v11, %v136_v62 }
  0xb2   :  { %v145_v17 = vmul.f32 %v143_v8, %v140_v13  ;;  %v146_v18 = vmul.f32 %v144_v3, %v141_v14 }
  0xb4   :  { %v152_v24 = vpop.permute.xlu0 %151  ;;  %v148_v29 = vadd.f32 %v146_v18, %v134_v23  ;;  %v147_v30 = vadd.f32 %v145_v17, %v133_v22  ;;  %v172_v36 = vpop.permute.xlu1 %171 }
  0xb5   :  { %v154_v25 = vsel %vm153_vm7, %v150_v19, %v152_v24  ;;  %v155_v26 = vsel %vm153_vm7, %v152_v24, %v150_v19 }
  0xb6   :  { %v159_v27 = vmul.f32 %v157_v20, %v154_v25  ;;  %v160_v28 = vmul.f32 %v158_v21, %v155_v26 }
  0xb8   :  { %v162_v31 = vadd.f32 %v160_v28, %v148_v29  ;;  %v161_v32 = vadd.f32 %v159_v27, %v147_v30  ;;  %v177_v37 = vpop.permute.xlu0 %176 }
  0xba   :  { %v164_v33 = vmax.f32 %v162_v31, 0.0  ;;  %v163_v12 = vmax.f32 %v161_v32, 0.0 }
  0xbc   :  { %186 = vmatprep.subr.mxu0 %v164_v33  ;;  %290 = vmatprep.subr.mxu1 %v164_v33 }
  0xbd   :  { %187 = vmatpush1.msra.mxu0 %v163_v12  ;;  %291 = vmatpush1.msra.mxu1 %v163_v12 }
  0xbe   :  { %288 = vmatmul.mubr.msk.f32.vlgmr.msra.gmra.mrb[0].mxu0 %vm179_vm8, %v165_v34  ;;  %289 = vmatmul.mubr.msk.f32.vlgmr.msra.gmra.mrb[0].mxu1 %vm179_vm8, %v166_v35 }
 0x191   :  { %v252_v38 = vpop.f32.mrb[0].mxu0  ;;  %v258_v39 = vpop.f32.mrb[0].mxu1 }
 0x192   :  { %v253_v40 = vadd.f32 %v252_v38, %v172_v36  ;;  %v259_v41 = vadd.f32 %v258_v39, %v177_v37  ;;  %v254_v42 = vpop.f32.mrb[1].mxu0  ;;  %v260_v43 = vpop.f32.mrb[1].mxu1 }
 0x193   :  { %v255_v44 = vadd.f32 %v254_v42, %v172_v36  ;;  %v261_v45 = vadd.f32 %v260_v43, %v177_v37 }
 0x194   :  { %v263_v46 = vmax.f32 %v253_v40, 0.0  ;;  %v265_v47 = vmax.f32 %v259_v41, 0.0 }
 0x195   :  { %v264_v48 = vmax.f32 %v255_v44, 0.0  ;;  %v266_v49 = vmax.f32 %v261_v45, 0.0 }
 0x196   :  { %267 = vst [vmem:[#allocation5] sm:$0xff] %v263_v46  ;;  %269 = vst [vmem:[#allocation5 + $0x10] sm:$0xff] %v265_v47 }
 0x197   :  { %268 = vst [vmem:[#allocation5 + $0x8] sm:$0xff] %v264_v48  ;;  %270 = vst [vmem:[#allocation5 + $0x18] sm:$0xff] %v266_v49 }
 0x198   :  { %340 = shalt.err (!%p337_p12)
}
 0x199   :  { %s341_s30 = scalar_lea.hbm %s488_s5, 512 }
 0x19a   :  { %p342_p13 = scmp.ne.s32.totalorder %s488_s5, %s341_s30  ;;  %p345_p0 = scmp.lt.u32.totalorder %s341_s30, %s488_s5 }
 0x19c   :  { %p347_p1 = pnand %p345_p0, %p342_p13 }
 0x19e   :  { %350 = shalt.err (!%p347_p1)
}
 0x19f   :  { %282 = dma.vmem_to_hbm [thread:$0]  %s277_s25, 512, %s488_s5, [#allocation4], %s356_s28, %s356_s28, %s357_s29  }
 0x1a0   :  { %353 = dma.done.wait [#allocation4], 512  }
 0x1a1   :  { %354 = vsyncadd [#allocation4], 4294966784 }
 0x1a2   :  { %286 = vsyncpa [#allocation3], 1 }
 0x1a3   :  { %287 = vsyncpa [#allocation4], 1 }

</bundles_post_ra>
